<compile_context>
chip_gen: v6e
topology: v6e:2x2x1
jax: 0.10.0
libtpu: 0.0.40
codegen_flags: <defaults>
</compile_context>

<pallas_src>
import functools

import jax
import jax.numpy as jnp
from jax.experimental import pallas as pl
from jax.experimental.pallas import tpu as pltpu

_NEG = -1e30  # "minus infinity" that stays finite in f32 arithmetic


def _round_up(x, m):
    return ((x + m - 1) // m) * m


def _ce_kernel(logits_ref, labels_ref, loss_ref, m_sc, l_sc, d_sc, *, c_total, block_c):
    """Online logsumexp over class tiles; per-row loss written on the last tile."""
    k = pl.program_id(1)
    nk = pl.num_programs(1)

    @pl.when(k == 0)
    def _():
        m_sc[...] = jnp.full(m_sc.shape, _NEG, jnp.float32)   # running max
        l_sc[...] = jnp.zeros_like(l_sc)                       # running sum exp(x - m)
        d_sc[...] = jnp.zeros_like(d_sc)                       # label logit (raw)

    x = logits_ref[...].astype(jnp.float32)                    # (bn, bc)
    lbl = labels_ref[...]                                      # (bn, 1) int32

    # global class ids of this class tile
    col = jax.lax.broadcasted_iota(jnp.int32, x.shape, 1) + k * block_c
    if c_total % block_c != 0:
        # partial edge tile: mask out-of-range classes so they never win the max
        # nor contribute to the sum-exp (exp(-1e30 - m) == 0).
        x = jnp.where(col < c_total, x, _NEG)

    # each label hits exactly one class tile
    d_sc[...] += jnp.sum(jnp.where(col == lbl, x, 0.0), axis=1, keepdims=True)

    # online logsumexp update
    m_prev = m_sc[...]
    m_new = jnp.maximum(m_prev, jnp.max(x, axis=1, keepdims=True))
    l_sc[...] = (l_sc[...] * jnp.exp(m_prev - m_new)
                 + jnp.sum(jnp.exp(x - m_new), axis=1, keepdims=True))
    m_sc[...] = m_new

    @pl.when(k == nk - 1)
    def _():
        # loss_row = logsumexp(x) - x[label] = m + log(l) - d
        loss_ref[...] = m_sc[...] + jnp.log(l_sc[...]) - d_sc[...]


@functools.partial(jax.jit, static_argnames=("block_n", "block_c"))
def my_cross_entropy_loss(logits, labels, *, block_n=None, block_c=None):
    """logits: (N, C) float, labels: (N,) int. Returns scalar float32 mean NLL."""
    n, c = logits.shape
    itemsize = jnp.dtype(logits.dtype).itemsize
    sub = 16 if itemsize < 4 else 8   # sublane packing (bf16 packs 16 rows/vreg)

    # --- class (lane) tiling: full class dim when it fits; else lane-dense 2048 tiles ---
    if block_c is None:
        block_c = c if c <= 2048 else 2048
    block_c = int(block_c)

    # --- batch (sublane) tiling: largest tile under a VMEM budget (f32 accounting) ---
    c_lane = _round_up(block_c, 128)
    if block_n is None:
        budget_bytes = 4 * 1024 * 1024                 # per logits pipeline buffer
        bn = budget_bytes // (c_lane * 4)
        bn = max((bn // sub) * sub, sub)
        bn = min(bn, 1024)
        block_n = int(n) if bn >= n else int(bn)       # full dim if it fits (always legal)
    block_n = int(block_n)

    grid_n = pl.cdiv(n, block_n)
    grid_c = pl.cdiv(c, block_c)

    labels2d = labels.astype(jnp.int32).reshape(n, 1)

    # --- VMEM limit: double-buffered logits tile + a few f32 temporaries + headroom ---
    n_sub = _round_up(block_n, sub)
    vmem_est = n_sub * c_lane * (2 * itemsize + 16) + (1 << 20)
    vmem_limit = int(min(max(vmem_est, 32 * 1024 * 1024), 64 * 1024 * 1024))

    cost = pl.CostEstimate(
        flops=5 * n * c,
        transcendentals=n * c,
        bytes_accessed=n * c * itemsize + 2 * n * 4,
    )

    kernel = functools.partial(_ce_kernel, c_total=int(c), block_c=block_c)

    per_row = pl.pallas_call(
        kernel,
        out_shape=jax.ShapeDtypeStruct((n, 1), jnp.float32),
        grid_spec=pltpu.PrefetchScalarGridSpec(
            num_scalar_prefetch=0,
            grid=(grid_n, grid_c),
            in_specs=[
                pl.BlockSpec((block_n, block_c), lambda i, k: (i, k)),
                pl.BlockSpec((block_n, 1), lambda i, k: (i, 0)),
            ],
            out_specs=pl.BlockSpec((block_n, 1), lambda i, k: (i, 0)),
            scratch_shapes=[
                pltpu.VMEM((block_n, 1), jnp.float32),   # running max m
                pltpu.VMEM((block_n, 1), jnp.float32),   # running sum-exp l
                pltpu.VMEM((block_n, 1), jnp.float32),   # label logit d
            ],
        ),
        compiler_params=pltpu.CompilerParams(
            dimension_semantics=("parallel", "arbitrary"),
            vmem_limit_bytes=vmem_limit,
        ),
        cost_estimate=cost,
    )(logits, labels2d)

    # final reduction in the wrapper (cheap, keeps the grid fully parallel)
    return jnp.sum(per_row[:, 0]) / jnp.float32(n)


if __name__ == "__main__":
    key = jax.random.PRNGKey(0)
    k1, k2 = jax.random.split(key)
    N, C = 16, 32
    logits = jax.random.normal(k1, (N, C), dtype=jnp.float32)
    labels = jax.random.randint(k2, (N,), 0, C, dtype=jnp.int32)

    loss = my_cross_entropy_loss(logits, labels)
    jax.block_until_ready(loss)

    # reference check (pure JAX, same math as the PyTorch module)
    scaled = logits - jnp.max(logits, axis=1, keepdims=True)
    diag = jnp.take_along_axis(scaled, labels[:, None], axis=1)
    lse = jnp.log(jnp.sum(jnp.exp(scaled), axis=1, keepdims=True))
    ref = -jnp.sum(diag - lse) / N
    assert jnp.allclose(loss, ref, rtol=1e-5, atol=1e-5), (loss, ref)

    # second check: non-aligned shapes exercising class-tile masking and row remainders
    N2, C2 = 100, 300
    l2 = jax.random.normal(k1, (N2, C2), dtype=jnp.float32)
    y2 = jax.random.randint(k2, (N2,), 0, C2, dtype=jnp.int32)
    loss2 = my_cross_entropy_loss(l2, y2, block_c=128)
    jax.block_until_ready(loss2)
    s2 = l2 - jnp.max(l2, axis=1, keepdims=True)
    ref2 = -jnp.sum(jnp.take_along_axis(s2, y2[:, None], 1)
                    - jnp.log(jnp.sum(jnp.exp(s2), axis=1, keepdims=True))) / N2
    assert jnp.allclose(loss2, ref2, rtol=1e-5, atol=1e-5), (loss2, ref2)

    print("KERNEL_OK")
</pallas_src>

<mosaic_0001>
module attributes {stable_mosaic.version = 11 : i64} {
  func.func @_ce_kernel(%arg0: i32, %arg1: i32, %arg2: memref<16x32xf32, #tpu.memory_space<vmem>>, %arg3: memref<16x1xi32, #tpu.memory_space<vmem>>, %arg4: memref<16x1xf32, #tpu.memory_space<vmem>>, %arg5: memref<16x1xf32, #tpu.memory_space<vmem>>, %arg6: memref<16x1xf32, #tpu.memory_space<vmem>>, %arg7: memref<16x1xf32, #tpu.memory_space<vmem>>) attributes {dimension_semantics = [#tpu.dimension_semantics<parallel>, #tpu.dimension_semantics<arbitrary>], iteration_bounds = array<i64: 1, 1>, scalar_prefetch = 0 : i64, scratch_operands = 3 : i64, tpu.core_type = #tpu.core_type<tc>, window_params = [{transform_indices = @transform_0, window_bounds = array<i64: 16, 32>}, {transform_indices = @transform_1, window_bounds = array<i64: 16, 1>}, {transform_indices = @transform_2, window_bounds = array<i64: 16, 1>}]} {
    %c0_i32 = arith.constant 0 : i32
    %0 = arith.cmpi eq, %arg1, %c0_i32 : i32
    %1 = arith.extui %0 : i1 to i32
    %c0_i32_0 = arith.constant 0 : i32
    %2 = arith.cmpi ne, %1, %c0_i32_0 : i32
    scf.if %2 {
      %cst_21 = arith.constant -1.000000e+30 : f32
      %37 = vector.broadcast %cst_21 : f32 to vector<16x1xf32>
      %c0_22 = arith.constant 0 : index
      %c0_23 = arith.constant 0 : index
      %38 = vector.load %arg5[%c0_22, %c0_23] : memref<16x1xf32, #tpu.memory_space<vmem>>, vector<16x1xf32>
      tpu.vector_store %arg5[%c0_22, %c0_23], %37 {strides = array<i32>} : memref<16x1xf32, #tpu.memory_space<vmem>>, vector<16x1xf32>,
      %cst_24 = arith.constant 0.000000e+00 : f32
      %39 = vector.broadcast %cst_24 : f32 to vector<16x1xf32>
      %c0_25 = arith.constant 0 : index
      %c0_26 = arith.constant 0 : index
      %40 = vector.load %arg6[%c0_25, %c0_26] : memref<16x1xf32, #tpu.memory_space<vmem>>, vector<16x1xf32>
      tpu.vector_store %arg6[%c0_25, %c0_26], %39 {strides = array<i32>} : memref<16x1xf32, #tpu.memory_space<vmem>>, vector<16x1xf32>,
      %cst_27 = arith.constant 0.000000e+00 : f32
      %41 = vector.broadcast %cst_27 : f32 to vector<16x1xf32>
      %c0_28 = arith.constant 0 : index
      %c0_29 = arith.constant 0 : index
      %42 = vector.load %arg7[%c0_28, %c0_29] : memref<16x1xf32, #tpu.memory_space<vmem>>, vector<16x1xf32>
      tpu.vector_store %arg7[%c0_28, %c0_29], %41 {strides = array<i32>} : memref<16x1xf32, #tpu.memory_space<vmem>>, vector<16x1xf32>,
    } else {
    }
    %c0 = arith.constant 0 : index
    %c0_1 = arith.constant 0 : index
    %3 = vector.load %arg2[%c0, %c0_1] : memref<16x32xf32, #tpu.memory_space<vmem>>, vector<16x32xf32>
    %c0_2 = arith.constant 0 : index
    %c0_3 = arith.constant 0 : index
    %4 = vector.load %arg3[%c0_2, %c0_3] : memref<16x1xi32, #tpu.memory_space<vmem>>, vector<16x1xi32>
    %5 = tpu.iota {dimensions = array<i32: 1>} : vector<16x32xi32>
    %c32_i32 = arith.constant 32 : i32
    %6 = arith.muli %arg1, %c32_i32 : i32
    %7 = vector.broadcast %6 : i32 to vector<16x32xi32>
    %8 = arith.addi %5, %7 : vector<16x32xi32>
    %c0_4 = arith.constant 0 : index
    %c0_5 = arith.constant 0 : index
    %9 = vector.load %arg7[%c0_4, %c0_5] : memref<16x1xf32, #tpu.memory_space<vmem>>, vector<16x1xf32>
    %10 = vector.broadcast %4 : vector<16x1xi32> to vector<16x32xi32>
    %11 = arith.cmpi eq, %8, %10 : vector<16x32xi32>
    %cst = arith.constant 0.000000e+00 : f32
    %12 = vector.broadcast %cst : f32 to vector<16x32xf32>
    %13 = arith.select %11, %3, %12 : vector<16x32xi1>, vector<16x32xf32>
    %cst_6 = arith.constant dense<0.000000e+00> : vector<16xf32>
    %14 = vector.multi_reduction <add>, %13, %cst_6 [1] : vector<16x32xf32> to vector<16xf32>
    %15 = vector.shape_cast %14 : vector<16xf32> to vector<16x1xf32>
    %16 = arith.addf %9, %15 : vector<16x1xf32>
    %c0_7 = arith.constant 0 : index
    %c0_8 = arith.constant 0 : index
    %17 = vector.load %arg7[%c0_7, %c0_8] : memref<16x1xf32, #tpu.memory_space<vmem>>, vector<16x1xf32>
    tpu.vector_store %arg7[%c0_7, %c0_8], %16 {strides = array<i32>} : memref<16x1xf32, #tpu.memory_space<vmem>>, vector<16x1xf32>,
    %c0_9 = arith.constant 0 : index
    %c0_10 = arith.constant 0 : index
    %18 = vector.load %arg5[%c0_9, %c0_10] : memref<16x1xf32, #tpu.memory_space<vmem>>, vector<16x1xf32>
    %cst_11 = arith.constant dense<0xFF800000> : vector<16xf32>
    %19 = vector.multi_reduction <maximumf>, %3, %cst_11 [1] : vector<16x32xf32> to vector<16xf32>
    %20 = vector.shape_cast %19 : vector<16xf32> to vector<16x1xf32>
    %21 = arith.maximumf %18, %20 : vector<16x1xf32>
    %c0_12 = arith.constant 0 : index
    %c0_13 = arith.constant 0 : index
    %22 = vector.load %arg6[%c0_12, %c0_13] : memref<16x1xf32, #tpu.memory_space<vmem>>, vector<16x1xf32>
    %23 = arith.subf %18, %21 : vector<16x1xf32>
    %24 = math.exp %23 : vector<16x1xf32>
    %25 = arith.mulf %22, %24 : vector<16x1xf32>
    %26 = vector.broadcast %21 : vector<16x1xf32> to vector<16x32xf32>
    %27 = arith.subf %3, %26 : vector<16x32xf32>
    %28 = math.exp %27 : vector<16x32xf32>
    %cst_14 = arith.constant dense<0.000000e+00> : vector<16xf32>
    %29 = vector.multi_reduction <add>, %28, %cst_14 [1] : vector<16x32xf32> to vector<16xf32>
    %30 = vector.shape_cast %29 : vector<16xf32> to vector<16x1xf32>
    %31 = arith.addf %25, %30 : vector<16x1xf32>
    %c0_15 = arith.constant 0 : index
    %c0_16 = arith.constant 0 : index
    %32 = vector.load %arg6[%c0_15, %c0_16] : memref<16x1xf32, #tpu.memory_space<vmem>>, vector<16x1xf32>
    tpu.vector_store %arg6[%c0_15, %c0_16], %31 {strides = array<i32>} : memref<16x1xf32, #tpu.memory_space<vmem>>, vector<16x1xf32>,
    %c0_17 = arith.constant 0 : index
    %c0_18 = arith.constant 0 : index
    %33 = vector.load %arg5[%c0_17, %c0_18] : memref<16x1xf32, #tpu.memory_space<vmem>>, vector<16x1xf32>
    tpu.vector_store %arg5[%c0_17, %c0_18], %21 {strides = array<i32>} : memref<16x1xf32, #tpu.memory_space<vmem>>, vector<16x1xf32>,
    %c0_i32_19 = arith.constant 0 : i32
    %34 = arith.cmpi eq, %arg1, %c0_i32_19 : i32
    %35 = arith.extui %34 : i1 to i32
    %c0_i32_20 = arith.constant 0 : i32
    %36 = arith.cmpi ne, %35, %c0_i32_20 : i32
    scf.if %36 {
      %c0_21 = arith.constant 0 : index
      %c0_22 = arith.constant 0 : index
      %37 = vector.load %arg5[%c0_21, %c0_22] : memref<16x1xf32, #tpu.memory_space<vmem>>, vector<16x1xf32>
      %c0_23 = arith.constant 0 : index
      %c0_24 = arith.constant 0 : index
      %38 = vector.load %arg6[%c0_23, %c0_24] : memref<16x1xf32, #tpu.memory_space<vmem>>, vector<16x1xf32>
      %39 = math.log %38 : vector<16x1xf32>
      %40 = arith.addf %37, %39 : vector<16x1xf32>
      %c0_25 = arith.constant 0 : index
      %c0_26 = arith.constant 0 : index
      %41 = vector.load %arg7[%c0_25, %c0_26] : memref<16x1xf32, #tpu.memory_space<vmem>>, vector<16x1xf32>
      %42 = arith.subf %40, %41 : vector<16x1xf32>
      %c0_27 = arith.constant 0 : index
      %c0_28 = arith.constant 0 : index
      %43 = vector.load %arg4[%c0_27, %c0_28] : memref<16x1xf32, #tpu.memory_space<vmem>>, vector<16x1xf32>
      tpu.vector_store %arg4[%c0_27, %c0_28], %42 {strides = array<i32>} : memref<16x1xf32, #tpu.memory_space<vmem>>, vector<16x1xf32>,
    } else {
    }
    return
  }
  func.func @transform_0(%arg0: i32, %arg1: i32) -> (i32, i32) {
    %c0_i32 = arith.constant 0 : i32
    return %arg0, %arg1 : i32, i32
  }
  func.func @transform_1(%arg0: i32, %arg1: i32) -> (i32, i32) {
    %c0_i32 = arith.constant 0 : i32
    %c0_i32_0 = arith.constant 0 : i32
    return %arg0, %c0_i32 : i32, i32
  }
  func.func @transform_2(%arg0: i32, %arg1: i32) -> (i32, i32) {
    %c0_i32 = arith.constant 0 : i32
    %c0_i32_0 = arith.constant 0 : i32
    return %arg0, %c0_i32 : i32, i32
  }
}

</mosaic_0001>

<bundles_post_ra>
// kernel: my_cross_entropy_loss.1
= control target key start
LH: loop header
LB: loop body
LE: loop exit
PB: predicated region body
PF: predicated region fallthrough
CT: control target
= control target key end

     0   :  { %vm43_vm0 = vcmask 261120   ;;  %vm15_vm1 = vcmask 7168   ;;  %v143_v2 = vmov -1e+30   ;;  %v144_v5 = vmov 0   ;;  %s199_s0 = inlined_call_operand.vmem [shape: f32[16,32], index: 0, kind: input, shape index: {}]   ;;  %s200_s1 = inlined_call_operand.vmem [shape: s32[16,1], index: 1, kind: input, shape index: {}]   ;;  %s201_s2 = inlined_call_operand.vmem [shape: f32[16,1], index: 2, kind: output, shape index: {}]  }
   0x1   :  { %v22_v0 = vld [vmem:[%s199_s0] sm:$0xff]  ;;  %v23_v1 = vld [vmem:[%s199_s0 + $0x8] sm:$0xff]  ;;  %16 = vst.msk [vmem:[#allocation2] sm:$0xff] %vm15_vm1, %v143_v2  ;;  %17 = vst.msk [vmem:[#allocation2 + $0x8] sm:$0xff] %vm15_vm1, %v143_v2  ;;  %129 = vset.pattern.permute.xlu1 %v144_v5  ;;  %130 = vset.pattern.permute.xlu0 %v144_v5  ;;  %v145_v6 = vmov 0.0   ;;  %v26_v17 = vlaneseq }
   0x2   :  { %v57_v3 = vsel %vm43_vm0, %v22_v0, -inf  ;;  %v60_v4 = vsel %vm43_vm0, %v23_v1, -inf  ;;  %18 = vst.msk [vmem:[#allocation3] sm:$0xff] %vm15_vm1, %v145_v6  ;;  %19 = vst.msk [vmem:[#allocation3 + $0x8] sm:$0xff] %vm15_vm1, %v145_v6  ;;  %v24_v7 = vld [vmem:[%s200_s1] sm:$0xff]  ;;  %v25_v16 = vld [vmem:[%s200_s1 + $0x8] sm:$0xff] }
   0x3   :  { %58 = vmax.xlane.f32.xlu0 %v57_v3  ;;  %20 = vst.msk [vmem:[#allocation4] sm:$0xff] %vm15_vm1, %v145_v6  ;;  %21 = vst.msk [vmem:[#allocation4 + $0x8] sm:$0xff] %vm15_vm1, %v145_v6  ;;  %v27_v18 = vand.u32 127, %v26_v17 }
   0x7   :  { %61 = vmax.xlane.f32.xlu0 %v60_v4 }
   0x8   :  { %v55_v8 = vld [vmem:[#allocation2] sm:$0xff]  ;;  %v56_v11 = vld [vmem:[#allocation2 + $0x8] sm:$0xff] }
   0x9   :  { %v65_v41 = vld [vmem:[#allocation3] sm:$0xff]  ;;  %v66_v45 = vld [vmem:[#allocation3 + $0x8] sm:$0xff] }
   0xa   :  { %v31_v35 = vld [vmem:[#allocation4] sm:$0xff]  ;;  %v32_v50 = vld [vmem:[#allocation4 + $0x8] sm:$0xff] }
  0x1d   :  { %34 = vperm.xlu0 %130, %v24_v7  }
  0x8c   :  { %v59_v9 = vpop.xlane.xlu0 %58 }
  0x8d   :  { %v63_v10 = vmax.f32 %v55_v8, %v59_v9 }
  0x8f   :  { %v67_v12 = vsub.f32 %v55_v8, %v63_v10  ;;  %101 = vst.msk [vmem:[#allocation2] sm:$0xff] %vm15_vm1, %v63_v10  ;;  %77 = vperm.xlu1 %129, %v63_v10  }
  0x90   :  { %v62_v13 = vpop.xlane.xlu0 %61 }
  0x91   :  { %v64_v14 = vmax.f32 %v56_v11, %v62_v13  ;;  %v69_v38 = vmul.f32 1.442695, %v67_v12 }
  0x93   :  { %v68_v15 = vsub.f32 %v56_v11, %v64_v14  ;;  %102 = vst.msk [vmem:[#allocation2 + $0x8] sm:$0xff] %vm15_vm1, %v64_v14  ;;  %82 = vperm.xlu1 %129, %v64_v14  }
  0x95   :  { %v71_v39 = vmul.f32 1.442695, %v68_v15 }
  0x96   :  { %v106_v57 = vld [vmem:[#allocation2] sm:$0xff] }
  0x97   :  { %37 = vperm.xlu1 %129, %v25_v16  }
  0x98   :  { %v35_v19 = vpop.permute.xlu0 %34 }
  0x99   :  { %vm39_vm2 = vcmp.eq.s32.totalorder %v27_v18, %v35_v19 }
  0x9a   :  { %v41_v20 = vsel %vm39_vm2, %v22_v0, 0.0  ;;  %v107_v63 = vld [vmem:[#allocation2 + $0x8] sm:$0xff] }
  0x9b   :  { %v44_v21 = vsel %vm43_vm0, %v41_v20, 0.0 }
  0x9c   :  { %45 = vadd.xlane.f32.xlu0 %v44_v21 }
 0x10a   :  { %v78_v22 = vpop.permute.xlu1 %77 }
 0x10b   :  { %v85_v23 = vsub.f32 %v22_v0, %v78_v22 }
 0x10d   :  { %v87_v24 = vmul.f32 1.442695, %v85_v23 }
 0x10e   :  { %v83_v25 = vpop.permute.xlu1 %82 }
 0x10f   :  { %131 = vpow2.f32 %v87_v24  ;;  %v86_v26 = vsub.f32 %v23_v1, %v83_v25 }
 0x111   :  { %v89_v27 = vmul.f32 1.442695, %v86_v26 }
 0x112   :  { %v38_v29 = vpop.permute.xlu1 %37 }
 0x113   :  { %133 = vpow2.f32 %v89_v27  ;;  %vm40_vm3 = vcmp.eq.s32.totalorder %v27_v18, %v38_v29 }
 0x114   :  { %v42_v33 = vsel %vm40_vm3, %v23_v1, 0.0  ;;  %135 = vpow2.f32 %v69_v38 }
 0x115   :  { %v47_v34 = vsel %vm43_vm0, %v42_v33, 0.0  ;;  %137 = vpow2.f32 %v71_v39 }
 0x11c   :  { %v132_v28 = vpop.eup %131 }
 0x11d   :  { %v91_v30 = vsel %vm43_vm0, %v132_v28, 0.0 }
 0x11e   :  { %92 = vadd.xlane.f32.xlu1 %v91_v30 }
 0x120   :  { %v134_v31 = vpop.eup %133 }
 0x121   :  { %v94_v32 = vsel %vm43_vm0, %v134_v31, 0.0  ;;  %v136_v40 = vpop.eup %135 }
 0x122   :  { %95 = vadd.xlane.f32.xlu1 %v94_v32  ;;  %v73_v42 = vmul.f32 %v136_v40, %v65_v41  ;;  %v138_v43 = vpop.eup %137 }
 0x123   :  { %v74_v47 = vmul.f32 %v138_v43, %v66_v45 }
 0x125   :  { %v46_v36 = vpop.xlane.xlu0 %45 }
 0x126   :  { %48 = vadd.xlane.f32.xlu1 %v47_v34  ;;  %v50_v37 = vadd.f32 %v46_v36, %v31_v35 }
 0x128   :  { %53 = vst.msk [vmem:[#allocation4] sm:$0xff] %vm15_vm1, %v50_v37 }
 0x12f   :  { %v116_v58 = vld [vmem:[#allocation4] sm:$0xff] }
 0x1a7   :  { %v93_v44 = vpop.xlane.xlu1 %92 }
 0x1a8   :  { %v97_v46 = vadd.f32 %v93_v44, %v73_v42 }
 0x1aa   :  { %99 = vst.msk [vmem:[#allocation3] sm:$0xff] %vm15_vm1, %v97_v46 }
 0x1ab   :  { %v96_v48 = vpop.xlane.xlu1 %95 }
 0x1ac   :  { %v98_v49 = vadd.f32 %v96_v48, %v74_v47 }
 0x1ae   :  { %100 = vst.msk [vmem:[#allocation3 + $0x8] sm:$0xff] %vm15_vm1, %v98_v49 }
 0x1af   :  { %v49_v51 = vpop.xlane.xlu1 %48 }
 0x1b0   :  { %v51_v52 = vadd.f32 %v49_v51, %v32_v50 }
 0x1b1   :  { %v108_v53 = vld [vmem:[#allocation3] sm:$0xff] }
 0x1b2   :  { %139 = vlog2.f32 %v108_v53  ;;  %54 = vst.msk [vmem:[#allocation4 + $0x8] sm:$0xff] %vm15_vm1, %v51_v52 }
 0x1b5   :  { %v109_v54 = vld [vmem:[#allocation3 + $0x8] sm:$0xff] }
 0x1b6   :  { %141 = vlog2.f32 %v109_v54 }
 0x1b9   :  { %v117_v1 = vld [vmem:[#allocation4 + $0x8] sm:$0xff] }
 0x1bf   :  { %v140_v55 = vpop.eup %139 }
 0x1c0   :  { %v111_v56 = vmul.f32 0.6931472, %v140_v55 }
 0x1c2   :  { %v114_v59 = vadd.f32 %v111_v56, %v106_v57 }
 0x1c3   :  { %v142_v60 = vpop.eup %141 }
 0x1c4   :  { %v113_v61 = vmul.f32 0.6931472, %v142_v60  ;;  %v118_v62 = vsub.f32 %v114_v59, %v116_v58 }
 0x1c6   :  { %v115_v0 = vadd.f32 %v113_v61, %v107_v63  ;;  %120 = vst.msk [vmem:[%s201_s2] sm:$0xff] %vm15_vm1, %v118_v62 }
 0x1c8   :  { %v119_v2 = vsub.f32 %v115_v0, %v117_v1 }
 0x1ca   :  { %121 = vst.msk [vmem:[%s201_s2 + $0x8] sm:$0xff] %vm15_vm1, %v119_v2 }

</bundles_post_ra>
